<compile_context>
chip_gen: v7x
topology: tpu7x:2x2x1
jax: 0.10.0
libtpu: 0.0.40
codegen_flags: <defaults>
</compile_context>

<pallas_src>
import functools

import jax
import jax.numpy as jnp
from jax.experimental import pallas as pl
from jax.experimental.pallas import tpu as pltpu


def _round_up(x: int, m: int) -> int:
    return ((x + m - 1) // m) * m


def _cdiv(a: int, b: int) -> int:
    return (a + b - 1) // b


def _vmem_capacity_bytes() -> int:
    try:
        return int(pltpu.get_tpu_info().vmem_capacity_bytes)
    except Exception:
        return 64 * 1024 * 1024   # conservative fallback (v7x per-TC VMEM)


def prepare_params(weight, bias, *, mxu_dtype=jnp.bfloat16):
    """One-time (init) packing of the Linear params for the kernel.

    Folds the input channel de-interleave into a zero-expanded weight so the
    kernel can consume x in its original interleaved (B, 2*in_dim) layout:
        wf[c, 2*i + c, o] = weight[o, i]   (zero elsewhere)
    Also pads out_dim to a lane multiple (128), keeps bias in f32, and casts
    the weight to the MXU operand dtype (bf16 by default).
    """
    out_dim, in_dim = weight.shape
    n_pad = _round_up(out_dim, 128)

    wt = weight.astype(jnp.float32).T                       # (in_dim, out_dim)
    if n_pad != out_dim:
        wt = jnp.pad(wt, ((0, 0), (0, n_pad - out_dim)))    # zero cols -> relu(0)=0
    zeros = jnp.zeros_like(wt)
    # Channel 0 reads even input positions, channel 1 the odd ones.
    w0 = jnp.stack([wt, zeros], axis=1).reshape(2 * in_dim, n_pad)
    w1 = jnp.stack([zeros, wt], axis=1).reshape(2 * in_dim, n_pad)
    wf = jnp.stack([w0, w1], axis=0).astype(mxu_dtype)      # (2, 2*in_dim, n_pad)

    b2 = bias.astype(jnp.float32).reshape(1, out_dim)
    if n_pad != out_dim:
        b2 = jnp.pad(b2, ((0, 0), (0, n_pad - out_dim)))
    return wf, b2, out_dim


def _root_square_mlp_kernel(x_ref, w_ref, b_ref, o_ref, *, mxu_dtype):
    # x_ref: (TB, 2*in_dim)    activations in their ORIGINAL interleaved layout
    # w_ref: (2, 2*in_dim, TN) channel-expanded weight (zeros at mismatched parity)
    # b_ref: (1, TN)           bias (f32)
    # o_ref: (TB, TN)          output tile
    xs = x_ref[...].astype(jnp.float32)
    sq = (xs * xs).astype(mxu_dtype)            # square in f32, feed MXU in mxu_dtype
    # One MXU matmul per channel, f32 accumulation (same total MACs as one fused
    # 2*TN-wide matmul; the de-interleave is encoded in the zero rows of w).
    z0 = jnp.dot(sq, w_ref[0], preferred_element_type=jnp.float32)
    z1 = jnp.dot(sq, w_ref[1], preferred_element_type=jnp.float32)
    b = b_ref[...]
    y = jnp.maximum(z0 + b, 0.0) + jnp.maximum(z1 + b, 0.0)   # per-channel ReLU, then sum
    o_ref[...] = jnp.sqrt(y).astype(o_ref.dtype)


def root_square_mlp(x, params, *, out_dtype=None, max_tile_b=512, max_tile_n=2048,
                    vmem_fraction=0.75):
    """RootSquareMLP forward. x: (B, 2*in_dim), params from prepare_params."""
    wf, b2, out_dim = params
    B, K = x.shape                                           # K = 2*in_dim
    assert wf.shape[1] == K, "x feature dim must equal 2*in_dim"
    n_pad = wf.shape[2]
    out_dtype = out_dtype if out_dtype is not None else x.dtype
    mxu_dtype = wf.dtype

    x_it = jnp.dtype(x.dtype).itemsize
    w_it = jnp.dtype(mxu_dtype).itemsize
    o_it = jnp.dtype(out_dtype).itemsize

    cap = _vmem_capacity_bytes()
    budget = int(cap * vmem_fraction)

    # ---- N tiling: prefer the full folded weight VMEM-resident (fetched from
    # HBM exactly once per call).  Budgeted double-buffered (conservative).
    def w_vmem(tn):
        return 2 * (2 * K * tn * w_it) + 2 * tn * 4          # weight + bias

    tn = min(n_pad, _round_up(max_tile_n, 128))
    while tn > 128 and w_vmem(tn) > budget // 2:
        tn = _round_up(_cdiv(tn, 2), 128)
    n_nt = _cdiv(n_pad, tn)
    tn = _round_up(_cdiv(n_pad, n_nt), 128)                  # equalized tiles (min padding)
    n_pad_t = tn * n_nt
    weight_resident = n_nt == 1

    # ---- batch tiling: largest sublane-aligned tile fitting the remaining
    # budget (double-buffered x / out blocks + in-kernel f32 intermediates).
    def b_vmem(tb):
        return (2 * tb * K * x_it + 2 * tb * tn * o_it
                + tb * K * (4 + w_it) + 3 * tb * tn * 4)

    b8 = _round_up(B, 8)
    tb = min(_round_up(max_tile_b, 8), b8)
    while tb > 8 and w_vmem(tn) + b_vmem(tb) > budget:
        tb = _round_up(_cdiv(tb, 2), 8)
    n_bt = _cdiv(b8, tb)
    tb = _round_up(_cdiv(b8, n_bt), 8)                       # equalized tiles (min padding)
    if weight_resident and n_bt == 1 and b8 >= 16:
        # Megacore hygiene: keep both v7x TensorCores busy (harmless elsewhere).
        n_bt = 2
        tb = _round_up(_cdiv(b8, n_bt), 8)
    b_pad = tb * n_bt

    if b_pad != B:
        x = jnp.pad(x, ((0, b_pad - B), (0, 0)))             # zero rows: harmless
    if n_pad_t != n_pad:                                      # rare (uneven N tiling only)
        wf = jnp.pad(wf, ((0, 0), (0, 0), (0, n_pad_t - n_pad)))
        b2 = jnp.pad(b2, ((0, 0), (0, n_pad_t - n_pad)))

    kernel = functools.partial(_root_square_mlp_kernel, mxu_dtype=mxu_dtype)
    vmem_limit = min(int(cap * 0.9), 112 * 1024 * 1024)

    if weight_resident:
        # Single streaming pass over x / out; weight + bias index_maps are
        # constant -> DMA'd once and VMEM-resident for the whole batch sweep.
        out = pl.pallas_call(
            kernel,
            out_shape=jax.ShapeDtypeStruct((b_pad, n_pad_t), out_dtype),
            grid=(n_bt,),
            in_specs=[
                pl.BlockSpec((tb, K), lambda i: (i, 0)),
                pl.BlockSpec((2, K, n_pad_t), lambda i: (0, 0, 0)),
                pl.BlockSpec((1, n_pad_t), lambda i: (0, 0)),
            ],
            out_specs=pl.BlockSpec((tb, n_pad_t), lambda i: (i, 0)),
            compiler_params=pltpu.CompilerParams(
                dimension_semantics=("parallel",),
                vmem_limit_bytes=vmem_limit,
            ),
        )(x, wf, b2)
    else:
        # Weight too large to keep resident: weight-stationary order (N outer,
        # batch inner) so each weight tile is fetched from HBM exactly once.
        out = pl.pallas_call(
            kernel,
            out_shape=jax.ShapeDtypeStruct((b_pad, n_pad_t), out_dtype),
            grid=(n_nt, n_bt),
            in_specs=[
                pl.BlockSpec((tb, K), lambda j, i: (i, 0)),
                pl.BlockSpec((2, K, tn), lambda j, i: (0, 0, j)),
                pl.BlockSpec((1, tn), lambda j, i: (0, j)),
            ],
            out_specs=pl.BlockSpec((tb, tn), lambda j, i: (i, j)),
            compiler_params=pltpu.CompilerParams(
                dimension_semantics=("parallel", "parallel"),
                vmem_limit_bytes=vmem_limit,
            ),
        )(x, wf, b2)

    return out[:B, :out_dim]


def _reference(x, weight, bias, mxu_dtype=jnp.float32):
    B = x.shape[0]
    out_dim, in_dim = weight.shape
    xr = x.reshape(B, in_dim, 2).transpose(0, 2, 1).astype(jnp.float32)   # (B, 2, in_dim)
    sq = (xr * xr).astype(mxu_dtype)
    w = weight.astype(mxu_dtype)
    z = jnp.einsum("bci,oi->bco", sq, w, preferred_element_type=jnp.float32)
    y = jnp.maximum(z + bias.astype(jnp.float32)[None, None, :], 0.0)
    return jnp.sqrt(jnp.sum(y, axis=1))


if __name__ == "__main__":
    key = jax.random.PRNGKey(0)
    kx, kw, kb, kx2, kw2, kb2, kx3, kw3, kb3 = jax.random.split(key, 9)

    # 1) f32 MXU path, aligned small shapes, tight tolerance.
    B, in_dim, out_dim = 32, 128, 128
    x = jax.random.normal(kx, (B, 2 * in_dim), dtype=jnp.float32)
    w = jax.random.normal(kw, (out_dim, in_dim), dtype=jnp.float32) * 0.05
    b = jax.random.normal(kb, (out_dim,), dtype=jnp.float32) * 0.05
    params_f32 = prepare_params(w, b, mxu_dtype=jnp.float32)
    out = jax.block_until_ready(root_square_mlp(x, params_f32))
    assert out.shape == (B, out_dim)
    assert jnp.allclose(out, _reference(w=None or x, weight=w, bias=b), atol=2e-4, rtol=2e-4) \
        if False else jnp.allclose(out, _reference(x, w, b), atol=2e-4, rtol=2e-4)
    assert jnp.allclose(out, _reference(x, w, b), atol=2e-4, rtol=2e-4)

    # 2) default bf16 MXU path (f32 in / f32 out), same shapes.
    params_bf16 = prepare_params(w, b)                       # mxu_dtype=bf16
    out = jax.block_until_ready(root_square_mlp(x, params_bf16))
    assert jnp.allclose(out, _reference(x, w, b, jnp.bfloat16), atol=5e-3, rtol=5e-3)

    # 3) ragged batch / out_dim exercise the padding path (weight-resident grid).
    B2, in2, out2 = 13, 128, 200
    x2 = jax.random.normal(kx2, (B2, 2 * in2), dtype=jnp.float32)
    w2 = jax.random.normal(kw2, (out2, in2), dtype=jnp.float32) * 0.05
    b2_ = jax.random.normal(kb2, (out2,), dtype=jnp.float32) * 0.05
    out2_v = jax.block_until_ready(root_square_mlp(x2, prepare_params(w2, b2_)))
    assert out2_v.shape == (B2, out2)
    assert jnp.allclose(out2_v, _reference(x2, w2, b2_, jnp.bfloat16), atol=5e-3, rtol=5e-3)

    # 4) forced N tiling (weight-stationary grid path) + bf16 activations/output.
    B3, in3, out3 = 40, 128, 384
    x3 = (jax.random.normal(kx3, (B3, 2 * in3), dtype=jnp.float32)).astype(jnp.bfloat16)
    w3 = jax.random.normal(kw3, (out3, in3), dtype=jnp.float32) * 0.05
    b3 = jax.random.normal(kb3, (out3,), dtype=jnp.float32) * 0.05
    out3_v = jax.block_until_ready(
        root_square_mlp(x3, prepare_params(w3, b3), max_tile_n=128))
    assert out3_v.shape == (B3, out3) and out3_v.dtype == jnp.bfloat16
    ref3 = _reference(x3.astype(jnp.float32), w3, b3, jnp.bfloat16)
    assert jnp.allclose(out3_v.astype(jnp.float32), ref3, atol=2e-2, rtol=2e-2)

    print("KERNEL_OK")
</pallas_src>

<mosaic_0001>
module attributes {stable_mosaic.version = 11 : i64} {
  func.func @_root_square_mlp_kernel(%arg0: i32, %arg1: memref<16x256xf32, #tpu.memory_space<vmem>>, %arg2: memref<2x256x128xf32, #tpu.memory_space<vmem>>, %arg3: memref<1x128xf32, #tpu.memory_space<vmem>>, %arg4: memref<16x128xf32, #tpu.memory_space<vmem>>) attributes {dimension_semantics = [#tpu.dimension_semantics<parallel>], iteration_bounds = array<i64: 2>, scalar_prefetch = 0 : i64, scratch_operands = 0 : i64, tpu.core_type = #tpu.core_type<tc>, window_params = [{transform_indices = @transform_0, window_bounds = array<i64: 16, 256>}, {pipeline_mode = #tpu.pipeline_mode<synchronous>, transform_indices = @transform_1, window_bounds = array<i64: 2, 256, 128>}, {pipeline_mode = #tpu.pipeline_mode<synchronous>, transform_indices = @transform_2, window_bounds = array<i64: 1, 128>}, {transform_indices = @transform_3, window_bounds = array<i64: 16, 128>}]} {
    %c0 = arith.constant 0 : index
    %c0_0 = arith.constant 0 : index
    %0 = vector.load %arg1[%c0, %c0_0] : memref<16x256xf32, #tpu.memory_space<vmem>>, vector<16x256xf32>
    %1 = arith.mulf %0, %0 : vector<16x256xf32>
    %c0_1 = arith.constant 0 : index
    %c0_2 = arith.constant 0 : index
    %c0_3 = arith.constant 0 : index
    %2 = vector.load %arg2[%c0_1, %c0_2, %c0_3] : memref<2x256x128xf32, #tpu.memory_space<vmem>>, vector<1x256x128xf32>
    %3 = vector.shape_cast %2 : vector<1x256x128xf32> to vector<256x128xf32>
    %cst = arith.constant dense<0.000000e+00> : vector<16x128xf32>
    %4 = tpu.matmul %1, %3, %cst {dimension_numbers = #tpu.dot_dimension_numbers<[1], [0], [0], [1], [0, 0, 1, 1], [], []>} : vector<16x256xf32>, vector<256x128xf32>, vector<16x128xf32> -> vector<16x128xf32>
    %c1 = arith.constant 1 : index
    %c0_4 = arith.constant 0 : index
    %c0_5 = arith.constant 0 : index
    %5 = vector.load %arg2[%c1, %c0_4, %c0_5] : memref<2x256x128xf32, #tpu.memory_space<vmem>>, vector<1x256x128xf32>
    %6 = vector.shape_cast %5 : vector<1x256x128xf32> to vector<256x128xf32>
    %cst_6 = arith.constant dense<0.000000e+00> : vector<16x128xf32>
    %7 = tpu.matmul %1, %6, %cst_6 {dimension_numbers = #tpu.dot_dimension_numbers<[1], [0], [0], [1], [0, 0, 1, 1], [], []>} : vector<16x256xf32>, vector<256x128xf32>, vector<16x128xf32> -> vector<16x128xf32>
    %c0_7 = arith.constant 0 : index
    %c0_8 = arith.constant 0 : index
    %8 = vector.load %arg3[%c0_7, %c0_8] : memref<1x128xf32, #tpu.memory_space<vmem>>, vector<1x128xf32>
    %9 = vector.broadcast %8 : vector<1x128xf32> to vector<16x128xf32>
    %10 = arith.addf %4, %9 : vector<16x128xf32>
    %cst_9 = arith.constant 0.000000e+00 : f32
    %11 = vector.broadcast %cst_9 : f32 to vector<16x128xf32>
    %12 = arith.maximumf %10, %11 : vector<16x128xf32>
    %13 = vector.broadcast %8 : vector<1x128xf32> to vector<16x128xf32>
    %14 = arith.addf %7, %13 : vector<16x128xf32>
    %cst_10 = arith.constant 0.000000e+00 : f32
    %15 = vector.broadcast %cst_10 : f32 to vector<16x128xf32>
    %16 = arith.maximumf %14, %15 : vector<16x128xf32>
    %17 = arith.addf %12, %16 : vector<16x128xf32>
    %18 = math.sqrt %17 : vector<16x128xf32>
    %c0_11 = arith.constant 0 : index
    %c0_12 = arith.constant 0 : index
    %19 = vector.load %arg4[%c0_11, %c0_12] : memref<16x128xf32, #tpu.memory_space<vmem>>, vector<16x128xf32>
    tpu.vector_store %arg4[%c0_11, %c0_12], %18 {strides = array<i32>} : memref<16x128xf32, #tpu.memory_space<vmem>>, vector<16x128xf32>,
    return
  }
  func.func @transform_0(%arg0: i32) -> (i32, i32) {
    %c0_i32 = arith.constant 0 : i32
    %c0_i32_0 = arith.constant 0 : i32
    return %arg0, %c0_i32 : i32, i32
  }
  func.func @transform_1(%arg0: i32) -> (i32, i32, i32) {
    %c0_i32 = arith.constant 0 : i32
    %c0_i32_0 = arith.constant 0 : i32
    %c0_i32_1 = arith.constant 0 : i32
    %c0_i32_2 = arith.constant 0 : i32
    return %c0_i32, %c0_i32_0, %c0_i32_1 : i32, i32, i32
  }
  func.func @transform_2(%arg0: i32) -> (i32, i32) {
    %c0_i32 = arith.constant 0 : i32
    %c0_i32_0 = arith.constant 0 : i32
    %c0_i32_1 = arith.constant 0 : i32
    return %c0_i32, %c0_i32_0 : i32, i32
  }
  func.func @transform_3(%arg0: i32) -> (i32, i32) {
    %c0_i32 = arith.constant 0 : i32
    %c0_i32_0 = arith.constant 0 : i32
    return %arg0, %c0_i32 : i32, i32
  }
}

</mosaic_0001>

<bundles_post_ra>
// kernel: tpu_custom_call.1
= control target key start
LH: loop header
LB: loop body
LE: loop exit
PB: predicated region body
PF: predicated region fallthrough
CT: control target
= control target key end

     0   :  { %8 = vsyncpa [#allocation3], 0  ;;  %s1154_s0 = inlined_call_operand.hbm [shape: f32[32,256], index: 0, kind: input, shape index: {}]   ;;  %s1155_s1 = inlined_call_operand.hbm [shape: f32[2,256,128], index: 1, kind: input, shape index: {}]   ;;  %s1156_s2 = inlined_call_operand.vmem [shape: f32[1,128], index: 2, kind: input, shape index: {}]   ;;  %s1157_s3 = inlined_call_operand.hbm [shape: f32[32,128], index: 3, kind: output, shape index: {}]  }
   0x1   :  { %10 = vsyncpa [#allocation3 + $0x1], 0 }
   0x2   :  { %11 = vsyncpa [#allocation6], 0 }
   0x3   :  { %12 = vsyncpa [#allocation4], 0 }
   0x4   :  { %14 = vsyncpa [#allocation4 + $0x1], 0  ;;  %s943_s12 = smov 0   ;;  %s945_s13 = smov 0  }
   0x5   :  { %s947_s14 = smov 0   ;;  %s949_s15 = smov 0  }
   0x6 LB: > { %s964_s16 = sadd.s32 4294967295, %s912_s15   ;;  %s556_s17 = sadd.s32 4294967294, %s912_s15   ;;  %s912_s15 = sphi %s949_s15, %s1177_s15   ;;  %s908_s14 = sphi %s947_s14, %s1176_s14   ;;  %s904_s13 = sphi %s945_s13, %s1175_s13   ;;  %s900_s12 = sphi %s943_s12, %s1174_s12  }
   0x7   : > { %p40_p0 = scmp.ne.s32.totalorder %s904_s13, %s900_s12  ;;  %p1158_p1 = scmp.eq.s32.totalorder %s964_s16, 0 }
   0x8   : > { %p112_p3 = scmp.eq.s32.totalorder %s556_s17, 1  ;;  %p557_p5 = scmp.ge.s32.totalorder %s912_s15, 1 }
   0x9   : > { %p973_p4 = por %p1158_p1, %p40_p0  ;;  %p119_p7 = scmp.lt.s32.totalorder %s912_s15, 3 }
   0xa   : > { %p978_p6 = por %p112_p3, %p40_p0  ;;  %s914_s21 = smov [#allocation5]  }
   0xb   : > { %s1161_s18 = scalar_select %p973_p4, 1, 0 }
   0xc   : > { %s1162_s19 = scalar_select %p978_p6, 1, 0 }
   0xd   : > { %p983_p8 = pnand %p557_p5, %p119_p7  ;;  %s131_s22 = sshll.u32 %s914_s21, 4  ;;  %s987_s22 = int_to_ptr.vmem [resolvable:$true] %s131_s22 }
   0xe   : > { %s999_s24 = sadd.s32 1, %s912_s15   ;;  %s27_s25 = sadd.s32 1, %s908_s14 }
   0xf   : > { %s1163_s20 = scalar_select %p983_p8, 1, 0 }
  0x10   : > { %p725_p9 = pneg %p983_p8  ;;  %s24_s26 = ssub.s32 %s912_s15, %s999_s24 }
  0x11   : > { %s784_s29 = scalar_lea.hbm %s1155_s1, 8192 }
  0x12   : > { %p994_p11 = pnand %p725_p9, %p1158_p1  ;;  %p785_p12 = scmp.ne.s32.totalorder %s1155_s1, %s784_s29 }
  0x13   : > { %p791_p5 = scmp.lt.u32.totalorder %s784_s29, %s1155_s1 }
  0x14   : > { %p786_p13 = pneg %p994_p11 }
  0x16   : > { %p787_p0 = pnand %p786_p13, %p785_p12 }
  0x18   : > { %p788_p3 = pneg %p787_p0 }
  0x1a   : > { %p793_p7 = pnand %p791_p5, %p788_p3 }
  0x1c   : > { %796 = shalt.err (!%p793_p7)
}
  0x1d   : > { %s797_s7 = scalar_lea.vmem %s987_s22, 8192  ;;  %p805_p2 = scmp.lt.s32.totalorder %s987_s22, %s987_s22 }
  0x1e   : > { %p798_p9 = scmp.ne.s32.totalorder %s987_s22, %s797_s7  ;;  %p806_p6 = scmp.lt.s32.totalorder %s797_s7, %s797_s7 }
  0x20   : > { %p800_p10 = pnand %p798_p9, %p786_p13  ;;  %p807_p4 = por %p806_p6, %p805_p2 }
  0x22   : > { %p801_p1 = pneg %p800_p10 }
  0x24   : > { %p808_p8 = pnand %p807_p4, %p801_p1 }
  0x26   : > { %811 = shalt.err (!%p808_p8)
}
  0x27   : > { %s915_s8 = smov 128   ;;  %s916_s9 = smov 8  }
  0x28   : > { %728 = dma.hbm_to_vmem [thread:$0]  (!%p994_p11), %s1155_s1, 8192, %s987_s22, [#allocation6], %s915_s8, %s915_s8, %s916_s9  }
  0x29   : > { %p25_p2 = scmp.eq.s32.totalorder %s24_s26, 0  ;;  %p34_p1 = scmp.ne.s32.totalorder %s908_s14, %s904_s13 }
  0x2a   : > { %p35_p4 = scmp.eq.s32.totalorder %s912_s15, 0  ;;  %p738_p6 = scmp.lt.s32.totalorder %s912_s15, 2 }
  0x2b   : > { %s1030_s17 = scalar_select %p25_p2, %s908_s14, %s27_s25  }
  0x2c   : > { %p36_p8 = por %p35_p4, %p34_p1  ;;  %p1165_p10 = scmp.eq.s32.totalorder %s964_s16, 1 }
  0x2d   : > { %s148_s27 = sand.u32 1, %s908_s14   ;;  %s575_s28 = sshll.u32 %s912_s15, 9 }
  0x2e   : > { %p1034_p12 = por %p1165_p10, %p34_p1  ;;  %s560_s29 = sshll.u32 %s148_s27, 5 }
  0x2f   : > { %s1043_s4 = scalar_lea.hbm %s1154_s0, %s575_s28  ;;  %s152_s22 = scalar_lea.vmem [#allocation2], %s560_s29 }
  0x30   : > { %s160_s25 = sshll.u32 %s152_s22, 4  ;;  %p1045_p11 = pnand %p738_p6, %p36_p8  ;;  %s1049_s25 = int_to_ptr.vmem [resolvable:$true] %s160_s25 }
  0x31   : > { %s1051_s5 = scalar_lea.sflag [#allocation3], %s148_s27  ;;  %s812_s6 = scalar_lea.hbm %s1043_s4, 512 }
  0x32   : > { %p813_p13 = scmp.ne.s32.totalorder %s1043_s4, %s812_s6  ;;  %p814_p0 = pneg %p1045_p11 }
  0x33   : > { %s817_s9 = scalar_lea.hbm %s1154_s0, 1024  ;;  %p818_p7 = scmp.lt.u32.totalorder %s1043_s4, %s1154_s0 }
  0x34   : > { %p815_p3 = pnand %p814_p0, %p813_p13  ;;  %p819_p9 = scmp.lt.u32.totalorder %s817_s9, %s812_s6 }
  0x35   : > { %p821_p1 = scmp.lt.u32.totalorder %s812_s6, %s1043_s4 }
  0x36   : > { %p816_p5 = pneg %p815_p3  ;;  %p820_p2 = por %p819_p9, %p818_p7 }
  0x38   : > { %p822_p4 = por %p821_p1, %p820_p2 }
  0x3a   : > { %p823_p6 = pnand %p822_p4, %p816_p5 }
  0x3c   : > { %826 = shalt.err (!%p823_p6)
}
  0x3d   : > { %s827_s27 = scalar_lea.vmem %s1049_s25, 512  ;;  %s917_s28 = smov [#allocation2]  }
  0x3e   : > { %p828_p8 = scmp.ne.s32.totalorder %s1049_s25, %s827_s27  ;;  %s832_s29 = sshll.u32 %s917_s28, 4  ;;  %s833_s29 = int_to_ptr.vmem [resolvable:$false] %s832_s29 }
  0x3f   : > { %s834_s23 = scalar_lea.vmem %s833_s29, 1024  ;;  %p835_p3 = scmp.lt.s32.totalorder %s1049_s25, %s833_s29 }
  0x40   : > { %p830_p10 = pnand %p828_p8, %p814_p0  ;;  %p836_p7 = scmp.lt.s32.totalorder %s834_s23, %s827_s27 }
  0x42   : > { %p831_p13 = pneg %p830_p10  ;;  %p837_p9 = por %p836_p7, %p835_p3 }
  0x44   : > { %p838_p2 = pnand %p837_p9, %p831_p13 }
  0x46   : > { %841 = shalt.err (!%p838_p2)
}
  0x47   : > { %s918_s30 = smov 256   ;;  %s919_s22 = smov 16  }
  0x48   : > { %732 = dma.hbm_to_vmem [thread:$0]  (!%p1045_p11), %s1043_s4, 512, %s1049_s25, %s1051_s5, %s918_s30, %s918_s30, %s919_s22  }
  0x49   : > { %p1168_p0 = scmp.ne.s32.totalorder %s1163_s20, 0 }
  0x4a   : > { %s1082_s6 = sand.u32 (!%p1168_p0), 1, %s904_s13   ;;  %p1169_p5 = scmp.ne.s32.totalorder (!%p1168_p0), %s1161_s18, 0 }
  0x4b   : > { %172 = sbr.rel (%p1168_p0) target bundleno = 378 (0x17a), region = 32  ;;  %s565_s7 = sshll.u32 (!%p1168_p0), %s1082_s6, 5 }
  0x4c   : > { %s175_s8 = scalar_lea.sflag (!%p1168_p0), [#allocation3], %s1082_s6  ;;  %s1086_s9 = scalar_lea.vmem (!%p1168_p0), [#allocation2], %s565_s7 }
  0x52   : > { %887 = dma.done.wait (%p1169_p5), %s175_s8, 512  }
  0x53   : > { %889 = vsyncadd (%p1169_p5), %s175_s8, 4294966784  ;;  %p1170_p11 = scmp.eq.s32.totalorder %s964_s16, 0 }
  0x55   : > { %891 = dma.done.wait (%p1170_p11), [#allocation6], 8192   ;;  %p1171_p1 = pmov %p1170_p11 }
  0x56   : > { %v231_v0 = vld [vmem:[#allocation5 + $0x80] sm:$0xff]  ;;  %v232_v1 = vld [vmem:[#allocation5 + $0x88] sm:$0xff]  ;;  %v233_v11 = vld [vmem:[#allocation5 + $0x90] sm:$0xff]  ;;  %s567_s4 = sshll.u32 %s1082_s6, 4  ;;  %s576_s25 = sshll.u32 %s964_s16, 8 }
  0x57   : > { %893 = vsyncadd (%p1171_p1), [#allocation6], 4294959104  ;;  %v264_v2 = vld [vmem:[#allocation5 + $0x180] sm:$0xff]  ;;  %v653_v3 = vpack.c.bf16 %v232_v1, %v231_v0  ;;  %v265_v4 = vld [vmem:[#allocation5 + $0x188] sm:$0xff]  ;;  %s204_s26 = scalar_lea.vmem [#allocation7], %s567_s4  ;;  %s1108_s27 = scalar_lea.hbm %s1157_s3, %s576_s25 }
  0x58   : > { %v215_v5 = vld [vmem:[#allocation5] sm:$0xff]  ;;  %v216_v6 = vld [vmem:[#allocation5 + $0x8] sm:$0xff]  ;;  %v685_v7 = vpack.c.bf16 %v265_v4, %v264_v2  ;;  %v234_v13 = vld [vmem:[#allocation5 + $0x98] sm:$0xff]  ;;  %s473_s5 = sshll.u32 %s204_s26, 4  ;;  %s460_s16 = scalar_lea.sflag [#allocation4], %s1082_s6  ;;  %s1110_s5 = int_to_ptr.vmem [resolvable:$true] %s473_s5 }
  0x59   : > { %v655_v8 = vpack.c.bf16 %v216_v6, %v215_v5  ;;  %v248_v9 = vld [vmem:[#allocation5 + $0x100] sm:$0xff]  ;;  %v249_v10 = vld [vmem:[#allocation5 + $0x108] sm:$0xff]  ;;  %654 = vmatprep.subr.bf16.mxu0 %v653_v3  ;;  %v266_v14 = vld [vmem:[#allocation5 + $0x190] sm:$0xff]  ;;  %v657_v16 = vpack.c.bf16 %v234_v13, %v233_v11  ;;  %s842_s28 = scalar_lea.vmem %s1110_s5, 256  ;;  %s920_s29 = smov [#allocation7]  }
  0x5a   : > { %v687_v12 = vpack.c.bf16 %v249_v10, %v248_v9  ;;  %v267_v15 = vld [vmem:[#allocation5 + $0x198] sm:$0xff]  ;;  %686 = vmatprep.subr.bf16.mxu1 %v685_v7  ;;  %v217_v18 = vld [vmem:[#allocation5 + $0x10] sm:$0xff]  ;;  %v235_v23 = vld [vmem:[#allocation5 + $0xa0] sm:$0xff]  ;;  %p843_p4 = scmp.ne.s32.totalorder %s1110_s5, %s842_s28  ;;  %s846_s23 = sshll.u32 %s920_s29, 4  ;;  %s847_s23 = int_to_ptr.vmem [resolvable:$false] %s846_s23 }
  0x5b   : > { %656 = vmatpush3.bf16.msra.mxu0 %v655_v8  ;;  %v689_v17 = vpack.c.bf16 %v267_v15, %v266_v14  ;;  %v218_v19 = vld [vmem:[#allocation5 + $0x18] sm:$0xff]  ;;  %v250_v20 = vld [vmem:[#allocation5 + $0x110] sm:$0xff]  ;;  %v236_v24 = vld [vmem:[#allocation5 + $0xa8] sm:$0xff]  ;;  %s848_s30 = scalar_lea.vmem %s847_s23, 512  ;;  %p849_p10 = scmp.lt.s32.totalorder %s1110_s5, %s847_s23 }
  0x5c   : > { %688 = vmatpush3.bf16.msra.mxu1 %v687_v12  ;;  %v659_v21 = vpack.c.bf16 %v218_v19, %v217_v18  ;;  %v251_v22 = vld [vmem:[#allocation5 + $0x118] sm:$0xff]  ;;  %658 = vmatprep.subr.bf16.mxu0 %v657_v16  ;;  %v661_v26 = vpack.c.bf16 %v236_v24, %v235_v23  ;;  %v268_v27 = vld [vmem:[#allocation5 + $0x1a0] sm:$0xff]  ;;  %v269_v28 = vld [vmem:[#allocation5 + $0x1a8] sm:$0xff]  ;;  %p844_p6 = pnand %p843_p4, %p1034_p12  ;;  %p850_p13 = scmp.lt.s32.totalorder %s848_s30, %s842_s28 }
  0x5d   : > { %690 = vmatprep.subr.bf16.mxu1 %v689_v17  ;;  %v691_v25 = vpack.c.bf16 %v251_v22, %v250_v20  ;;  %v219_v29 = vld [vmem:[#allocation5 + $0x20] sm:$0xff]  ;;  %v693_v30 = vpack.c.bf16 %v269_v28, %v268_v27  ;;  %v220_v31 = vld [vmem:[#allocation5 + $0x28] sm:$0xff]  ;;  %v237_v35 = vld [vmem:[#allocation5 + $0xb0] sm:$0xff] }
  0x5e   : > { %v252_v32 = vld [vmem:[#allocation5 + $0x120] sm:$0xff]  ;;  %v253_v33 = vld [vmem:[#allocation5 + $0x128] sm:$0xff]  ;;  %v663_v34 = vpack.c.bf16 %v220_v31, %v219_v29  ;;  %v238_v36 = vld [vmem:[#allocation5 + $0xb8] sm:$0xff]  ;;  %p845_p8 = pneg %p844_p6  ;;  %p851_p3 = por %p850_p13, %p849_p10 }
  0x5f   : > { %660 = vmatpush3.bf16.msra.mxu0 %v659_v21  ;;  %v270_v37 = vld [vmem:[#allocation5 + $0x1b0] sm:$0xff]  ;;  %v695_v38 = vpack.c.bf16 %v253_v33, %v252_v32  ;;  %v665_v39 = vpack.c.bf16 %v238_v36, %v237_v35  ;;  %v271_v40 = vld [vmem:[#allocation5 + $0x1b8] sm:$0xff]  ;;  %v239_v46 = vld [vmem:[#allocation5 + $0xc0] sm:$0xff] }
  0x60   : > { %692 = vmatpush3.bf16.msra.mxu1 %v691_v25  ;;  %662 = vmatprep.subr.bf16.mxu0 %v661_v26  ;;  %v221_v41 = vld [vmem:[#allocation5 + $0x30] sm:$0xff]  ;;  %v222_v42 = vld [vmem:[#allocation5 + $0x38] sm:$0xff]  ;;  %v697_v43 = vpack.c.bf16 %v271_v40, %v270_v37  ;;  %v240_v47 = vld [vmem:[#allocation5 + $0xc8] sm:$0xff]  ;;  %p852_p7 = pnand %p851_p3, %p845_p8 }
  0x61   : > { %694 = vmatprep.subr.bf16.mxu1 %v693_v30  ;;  %v254_v44 = vld [vmem:[#allocation5 + $0x130] sm:$0xff]  ;;  %v255_v45 = vld [vmem:[#allocation5 + $0x138] sm:$0xff]  ;;  %v272_v48 = vld [vmem:[#allocation5 + $0x1c0] sm:$0xff]  ;;  %v667_v50 = vpack.c.bf16 %v222_v42, %v221_v41  ;;  %v669_v52 = vpack.c.bf16 %v240_v47, %v239_v46 }
  0x62   : > { %v273_v49 = vld [vmem:[#allocation5 + $0x1c8] sm:$0xff]  ;;  %v699_v51 = vpack.c.bf16 %v255_v45, %v254_v44  ;;  %v223_v53 = vld [vmem:[#allocation5 + $0x40] sm:$0xff]  ;;  %v241_v58 = vld [vmem:[#allocation5 + $0xd0] sm:$0xff] }
  0x63   : > { %664 = vmatpush3.bf16.msra.mxu0 %v663_v34  ;;  %v224_v54 = vld [vmem:[#allocation5 + $0x48] sm:$0xff]  ;;  %v256_v55 = vld [vmem:[#allocation5 + $0x140] sm:$0xff]  ;;  %v701_v56 = vpack.c.bf16 %v273_v49, %v272_v48  ;;  %v242_v59 = vld [vmem:[#allocation5 + $0xd8] sm:$0xff] }
  0x64   : > { %696 = vmatpush3.bf16.msra.mxu1 %v695_v38  ;;  %666 = vmatprep.subr.bf16.mxu0 %v665_v39  ;;  %v257_v57 = vld [vmem:[#allocation5 + $0x148] sm:$0xff]  ;;  %v274_v60 = vld [vmem:[#allocation5 + $0x1d0] sm:$0xff]  ;;  %v275_v61 = vld [vmem:[#allocation5 + $0x1d8] sm:$0xff]  ;;  %v671_v62 = vpack.c.bf16 %v224_v54, %v223_v53  ;;  %v673_v0 = vpack.c.bf16 %v242_v59, %v241_v58 }
  0x65   : > { %698 = vmatprep.subr.bf16.mxu1 %v697_v43  ;;  %v703_v63 = vpack.c.bf16 %v257_v57, %v256_v55  ;;  %v225_v1 = vld [vmem:[#allocation5 + $0x50] sm:$0xff]  ;;  %v226_v2 = vld [vmem:[#allocation5 + $0x58] sm:$0xff]  ;;  %v705_v4 = vpack.c.bf16 %v275_v61, %v274_v60  ;;  %v243_v6 = vld [vmem:[#allocation5 + $0xe0] sm:$0xff] }
  0x66   : > { %v258_v3 = vld [vmem:[#allocation5 + $0x150] sm:$0xff]  ;;  %v259_v5 = vld [vmem:[#allocation5 + $0x158] sm:$0xff]  ;;  %v244_v7 = vld [vmem:[#allocation5 + $0xe8] sm:$0xff]  ;;  %v675_v10 = vpack.c.bf16 %v226_v2, %v225_v1 }
  0x67   : > { %668 = vmatpush3.bf16.msra.mxu0 %v667_v50  ;;  %v276_v8 = vld [vmem:[#allocation5 + $0x1e0] sm:$0xff]  ;;  %v277_v9 = vld [vmem:[#allocation5 + $0x1e8] sm:$0xff]  ;;  %v707_v12 = vpack.c.bf16 %v259_v5, %v258_v3  ;;  %v677_v13 = vpack.c.bf16 %v244_v7, %v243_v6  ;;  %v245_v19 = vld [vmem:[#allocation5 + $0xf0] sm:$0xff] }
  0x68   : > { %700 = vmatpush3.bf16.msra.mxu1 %v699_v51  ;;  %670 = vmatprep.subr.bf16.mxu0 %v669_v52  ;;  %v227_v11 = vld [vmem:[#allocation5 + $0x60] sm:$0xff]  ;;  %v228_v14 = vld [vmem:[#allocation5 + $0x68] sm:$0xff]  ;;  %v709_v17 = vpack.c.bf16 %v277_v9, %v276_v8  ;;  %v246_v20 = vld [vmem:[#allocation5 + $0xf8] sm:$0xff] }
  0x69   : > { %702 = vmatprep.subr.bf16.mxu1 %v701_v56  ;;  %v260_v15 = vld [vmem:[#allocation5 + $0x160] sm:$0xff]  ;;  %v208_v16 = vld [vmem:[%s1086_s9 + $0x8] sm:$0xff]  ;;  %v278_v22 = vld [vmem:[#allocation5 + $0x1f0] sm:$0xff]  ;;  %v679_v24 = vpack.c.bf16 %v228_v14, %v227_v11  ;;  %v681_v26 = vpack.c.bf16 %v246_v20, %v245_v19 }
  0x6a   : > { %v261_v18 = vld [vmem:[#allocation5 + $0x168] sm:$0xff]  ;;  %v212_v21 = vmul.f32 %v208_v16, %v208_v16  ;;  %v279_v23 = vld [vmem:[#allocation5 + $0x1f8] sm:$0xff]  ;;  %v229_v27 = vld [vmem:[#allocation5 + $0x70] sm:$0xff] }
  0x6b   : > { %672 = vmatpush3.bf16.msra.mxu0 %v671_v62  ;;  %v711_v25 = vpack.c.bf16 %v261_v18, %v260_v15  ;;  %v230_v28 = vld [vmem:[#allocation5 + $0x78] sm:$0xff]  ;;  %v713_v29 = vpack.c.bf16 %v279_v23, %v278_v22  ;;  %v262_v30 = vld [vmem:[#allocation5 + $0x170] sm:$0xff]  ;;  %v207_v33 = vld [vmem:[%s1086_s9] sm:$0xff] }
  0x6c   : > { %704 = vmatpush3.bf16.msra.mxu1 %v703_v63  ;;  %674 = vmatprep.subr.bf16.mxu0 %v673_v0  ;;  %v263_v31 = vld [vmem:[#allocation5 + $0x178] sm:$0xff]  ;;  %v683_v32 = vpack.c.bf16 %v230_v28, %v229_v27  ;;  %v211_v36 = vmul.f32 %v207_v33, %v207_v33  ;;  %v209_v38 = vld [vmem:[%s1086_s9 + $0x10] sm:$0xff]  ;;  %v568_v42 = vld [vmem:[%s1156_s2] ss:$0 sm:$0xff] }
  0x6d   : > { %706 = vmatprep.subr.bf16.mxu1 %v705_v4  ;;  %351 = vmatprep.mubr.f32.mxu0 %v212_v21  ;;  %v715_v34 = vpack.c.bf16 %v263_v31, %v262_v30  ;;  %v210_v35 = vld [vmem:[%s1086_s9 + $0x18] sm:$0xff]  ;;  %v213_v39 = vmul.f32 %v209_v38, %v209_v38 }
  0x6e   : > { %428 = vmatprep.mubr.f32.mxu1 %v212_v21  ;;  %v214_v37 = vmul.f32 %v210_v35, %v210_v35 }
  0x6f   : > { %676 = vmatpush3.bf16.msra.mxu0 %v675_v10 }
  0x70   : > { %708 = vmatpush3.bf16.msra.mxu1 %v707_v12  ;;  %678 = vmatprep.subr.bf16.mxu0 %v677_v13 }
  0x71   : > { %710 = vmatprep.subr.bf16.mxu1 %v709_v17 }
  0x73   : > { %680 = vmatpush3.bf16.msra.mxu0 %v679_v24 }
  0x74   : > { %712 = vmatpush3.bf16.msra.mxu1 %v711_v25  ;;  %682 = vmatprep.subr.bf16.mxu0 %v681_v26 }
  0x75   : > { %714 = vmatprep.subr.bf16.mxu1 %v713_v29 }
  0x77   : > { %684 = vmatpush3.bf16.msra.mxu0 %v683_v32 }
  0x78   : > { %716 = vmatpush3.bf16.msra.mxu1 %v715_v34 }
  0x7a   : > { %352 = vmatmul.mubr.f32.vlgmr.msra.gmra.mrb[0].mxu0 %v211_v36 }
  0x7b   : > { %429 = vmatmul.mubr.f32.vlgmr.msra.gmra.mrb[0].mxu1 %v211_v36  ;;  %356 = vmatprep.mubr.f32.mxu0 %v214_v37 }
  0x7c   : > { %433 = vmatprep.mubr.f32.mxu1 %v214_v37 }
  0x7e   : > { %357 = vmatmul.mubr.f32.gmra.mrb[2].mxu0 %v213_v39 }
  0x7f   : > { %434 = vmatmul.mubr.f32.gmra.mrb[2].mxu1 %v213_v39 }
 0x14d   : > { %v609_v40 = vpop.f32.mrb[0].mxu0 }
 0x14e   : > { %v647_v41 = vpop.f32.mrb[0].mxu1  ;;  %v610_v43 = vpop.f32.mrb[1].mxu0 }
 0x14f   : > { %v611_v44 = vadd.f32 %v610_v43, %v609_v40  ;;  %v648_v45 = vpop.f32.mrb[1].mxu1 }
 0x150   : > { %v649_v46 = vadd.f32 %v648_v45, %v647_v41 }
 0x151   : > { %v354_v47 = vadd.f32 %v611_v44, %v568_v42  ;;  %v612_v48 = vpop.f32.mrb[2].mxu0 }
 0x152   : > { %v431_v49 = vadd.f32 %v649_v46, %v568_v42  ;;  %v650_v50 = vpop.f32.mrb[2].mxu1  ;;  %v613_v51 = vpop.f32.mrb[3].mxu0 }
 0x153   : > { %v362_v52 = vmax.f32 %v354_v47, 0.0  ;;  %v614_v53 = vadd.f32 %v613_v51, %v612_v48  ;;  %v651_v54 = vpop.f32.mrb[3].mxu1 }
 0x154   : > { %v439_v55 = vmax.f32 %v431_v49, 0.0  ;;  %v652_v56 = vadd.f32 %v651_v54, %v650_v50 }
 0x155   : > { %v359_v57 = vadd.f32 %v614_v53, %v568_v42 }
 0x156   : > { %v441_v58 = vadd.f32 %v439_v55, %v362_v52  ;;  %v436_v59 = vadd.f32 %v652_v56, %v568_v42 }
 0x157   : > { %v363_v60 = vmax.f32 %v359_v57, 0.0 }
 0x158   : > { %780 = vrsqrt.f32 %v441_v58  ;;  %v440_v61 = vmax.f32 %v436_v59, 0.0  ;;  %vm445_vm0 = vcmp.eq.f32.partialorder %v441_v58, inf  ;;  %v448_v1 = vand.u32 2147483648, %v441_v58 }
 0x159   : > { %vm447_vm1 = vcmp.eq.f32.partialorder %v441_v58, 0.0 }
 0x15a   : > { %v442_v62 = vadd.f32 %v440_v61, %v363_v60 }
 0x15c   : > { %782 = vrsqrt.f32 %v442_v62  ;;  %vm452_vm2 = vcmp.eq.f32.partialorder %v442_v62, inf  ;;  %v455_v6 = vand.u32 2147483648, %v442_v62  ;;  %vm454_vm3 = vcmp.eq.f32.partialorder %v442_v62, 0.0 }
 0x162   : > { %v781_v63 = vpop.eup %780 }
 0x163   : > { %v444_v0 = vmul.f32 %v781_v63, %v441_v58 }
 0x165   : > { %v446_v2 = vsel %vm445_vm0, %v441_v58, %v444_v0 }
 0x166   : > { %v783_v3 = vpop.eup %782  ;;  %v449_v4 = vsel %vm447_vm1, %v448_v1, %v446_v2 }
 0x167   : > { %v451_v5 = vmul.f32 %v783_v3, %v442_v62  ;;  %457 = vst [vmem:[%s204_s26] sm:$0xff] %v449_v4 }
 0x169   : > { %v453_v7 = vsel %vm452_vm2, %v442_v62, %v451_v5 }
 0x16a   : > { %v456_v8 = vsel %vm454_vm3, %v455_v6, %v453_v7 }
 0x16b   : > { %458 = vst [vmem:[%s204_s26 + $0x8] sm:$0xff] %v456_v8 }
 0x16c   : > { %855 = shalt.err (!%p852_p7)
}
 0x16d   : > { %s856_s22 = scalar_lea.hbm %s1108_s27, 256  ;;  %s860_s9 = scalar_lea.hbm %s1157_s3, 512 }
 0x16e   : > { %p857_p9 = scmp.ne.s32.totalorder %s1108_s27, %s856_s22  ;;  %p861_p5 = scmp.lt.u32.totalorder %s1108_s27, %s1157_s3 }
 0x16f   : > { %p862_p11 = scmp.lt.u32.totalorder %s860_s9, %s856_s22  ;;  %p864_p4 = scmp.lt.u32.totalorder %s856_s22, %s1108_s27 }
 0x170   : > { %p858_p2 = pnand %p857_p9, %p1034_p12 }
 0x171   : > { %p863_p1 = por %p862_p11, %p861_p5 }
 0x172   : > { %p859_p0 = pneg %p858_p2 }
 0x173   : > { %p865_p6 = por %p864_p4, %p863_p1 }
 0x175   : > { %p866_p8 = pnand %p865_p6, %p859_p0 }
 0x177   : > { %869 = shalt.err (!%p866_p8)
}
 0x178   : > { %s921_s4 = smov 128   ;;  %s922_s25 = smov 8  }
 0x179   : > { %723 = dma.vmem_to_hbm [thread:$0]  (%p1034_p12), %s1110_s5, 256, %s1108_s27, %s460_s16, %s921_s4, %s921_s4, %s922_s25  }
 0x17a PF: > { %s488_s26 = sand.u32 1, %s900_s12   ;;  %p1172_p10 = scmp.ne.s32.totalorder %s1162_s19, 0 }
 0x17b   : > { %p1173_p13 = scmp.ge.s32.totalorder %s912_s15, 2  ;;  %s489_s10 = scalar_lea.sflag [#allocation4], %s488_s26 }
 0x17d   : > { %p734_p3 = pnand %p1173_p13, %p1172_p10 }
 0x17f   : > { %895 = dma.done.wait (!%p734_p3), %s489_s10, 256  }
 0x180   : > { %897 = vsyncadd (!%p734_p3), %s489_s10, 4294967040  ;;  %p17_p7 = scmp.ge.s32.totalorder %s999_s24, 4   ;;  %s1174_s12 = smov %s904_s13 }
 0x181   : > { %s1175_s13 = smov %s908_s14  ;;  %s1176_s14 = smov %s1030_s17 }
 0x182   : > { %s1177_s15 = smov %s999_s24  ;;  %19 = sbr.rel (!%p17_p7) target bundleno = 6 (0x6), region = 82 }
 0x189   :  { %494 = vsyncpa [#allocation3], 1 }
 0x18a   :  { %496 = vsyncpa [#allocation3 + $0x1], 1 }
 0x18b   :  { %497 = vsyncpa [#allocation6], 1 }
 0x18c   :  { %498 = vsyncpa [#allocation4], 1 }
 0x18d   :  { %500 = vsyncpa [#allocation4 + $0x1], 1 }

</bundles_post_ra>
